<compile_context>
chip_gen: v5e
topology: v5e:2x2
jax: 0.10.0
libtpu: 0.0.40
codegen_flags: <defaults>
</compile_context>

<pallas_src>
import math

import jax
import jax.numpy as jnp
from jax.experimental import pallas as pl
from jax.experimental.pallas import tpu as pltpu

_LANE = 128                              # vreg lane width
_TARGET_BLOCK_BYTES = 4 * 1024 * 1024    # ~4 MiB per block (x6 live buffers)
_VMEM_LIMIT_BYTES = 48 * 1024 * 1024     # < 64 MiB physical VMEM on v7x


def make_positional_encoding(d_model: int, max_len: int = 512,
                             dtype=jnp.float32) -> jnp.ndarray:
    """Build the `pe` buffer exactly as in PositionalEncoding.__init__,
    already in the model dtype (avoids a per-forward cast pass)."""
    if d_model % 2 != 0:
        raise ValueError("d_model must be even (matches the PyTorch module).")
    position = jnp.arange(0, max_len, dtype=jnp.float32)[:, None]          # (max_len, 1)
    div_term = jnp.exp(
        jnp.arange(0, d_model, 2, dtype=jnp.float32)
        * -(math.log(10000.0) / d_model)
    )                                                                       # (d_model/2,)
    ang = position * div_term                                               # (max_len, d/2)
    # interleave: even columns = sin, odd columns = cos
    pe = jnp.stack([jnp.sin(ang), jnp.cos(ang)], axis=-1).reshape(max_len, d_model)
    return pe[None, :, :].astype(dtype)                                     # (1, max_len, d_model)


def _pe_add_kernel(x_ref, pe_ref, o_ref):
    # x_ref/o_ref: (t_b, t_rows, lane) tile spanning t_b batch elements.
    # pe_ref:      (t_rows, lane) shared tile, broadcast over the batch dim.
    # Pure VPU add; strictly HBM-bound.
    o_ref[...] = x_ref[...] + pe_ref[...]


def _choose_tiles(batch: int, rows: int, lane: int, itemsize: int,
                  target_bytes: int):
    """Pick (t_b, t_rows) so the x/out block is as close to target_bytes as
    possible while keeping legal (sublane-aligned) row tiles."""
    packing = max(1, 4 // itemsize)       # 1 for f32, 2 for bf16, 4 for i8/fp8
    sublane = 8 * packing                 # dtype-aware sublane granularity
    per_batch_bytes = rows * lane * itemsize
    if per_batch_bytes <= target_bytes:
        # Whole per-batch extent fits: grow the block over the batch axis.
        t_rows = rows
        t_b = max(1, min(batch, target_bytes // per_batch_bytes))
    else:
        # One batch element per block: tile the row axis.
        t_b = 1
        row_bytes = lane * itemsize
        max_rows = max(sublane,
                       (target_bytes // max(1, row_bytes)) // sublane * sublane)
        t_rows = rows if rows <= max_rows else max_rows
    return t_b, t_rows


def positional_encoding_forward(x: jnp.ndarray, pe: jnp.ndarray,
                                *, donate_x: bool = False,
                                target_block_bytes: int = _TARGET_BLOCK_BYTES
                                ) -> jnp.ndarray:
    """x: (B, S, D), pe: (1, max_len, D) -> (B, S, D) == x + pe[:, :S]."""
    B, S, D = x.shape
    if pe.ndim != 3 or pe.shape[0] != 1 or pe.shape[2] != D:
        raise ValueError(f"pe must have shape (1, max_len, {D}), got {pe.shape}")
    max_len = pe.shape[1]
    if S > max_len:
        raise ValueError(f"sequence length {S} exceeds max_len {max_len}")

    pe_s = pe[0, :S, :]
    if pe_s.dtype != x.dtype:
        # Prefer building pe in the model dtype at init; this is a fallback.
        pe_s = pe_s.astype(x.dtype)

    itemsize = jnp.dtype(x.dtype).itemsize
    total = S * D

    if total % _LANE == 0:
        # Lane-dense view: last dim = 128 -> unmasked full-width stores.
        lane = _LANE
        rows = total // _LANE
        x_v = x.reshape(B, rows, lane)
        pe_v = pe_s.reshape(rows, lane)
    else:
        # Fallback: keep original layout (last dim = D, may use masked stores).
        lane = D
        rows = S
        x_v = x
        pe_v = pe_s

    t_b, t_rows = _choose_tiles(B, rows, lane, itemsize, target_block_bytes)
    n_row_tiles = pl.cdiv(rows, t_rows)
    n_batch_tiles = pl.cdiv(B, t_b)

    # Pin the megacore split to whichever axis actually has >1 step; keep the
    # batch axis innermost so the pe tile (index depends only on r) stays
    # resident across consecutive steps.
    if n_row_tiles > 1:
        dim_sem = ("parallel", "arbitrary")
    else:
        dim_sem = ("arbitrary", "parallel")

    cost = pl.CostEstimate(
        flops=B * total,
        transcendentals=0,
        bytes_accessed=(2 * B * total + total) * itemsize,  # read x + pe, write out
    )

    out = pl.pallas_call(
        _pe_add_kernel,
        out_shape=jax.ShapeDtypeStruct((B, rows, lane), x.dtype),
        grid_spec=pl.GridSpec(
            grid=(n_row_tiles, n_batch_tiles),
            in_specs=[
                pl.BlockSpec((t_b, t_rows, lane), lambda r, b: (b, r, 0)),   # x tile
                pl.BlockSpec((t_rows, lane), lambda r, b: (r, 0)),           # pe tile
            ],
            out_specs=pl.BlockSpec((t_b, t_rows, lane), lambda r, b: (b, r, 0)),
        ),
        compiler_params=pltpu.CompilerParams(
            dimension_semantics=dim_sem,
            vmem_limit_bytes=_VMEM_LIMIT_BYTES,
        ),
        cost_estimate=cost,
        input_output_aliases=({0: 0} if donate_x else {}),
    )(x_v, pe_v)

    return out.reshape(B, S, D)


if __name__ == "__main__":
    MAX_LEN = 512

    # 1) Small shapes consistent with the module's forward: (batch, seq, d_model).
    B, S, D = 2, 8, 32
    key = jax.random.PRNGKey(0)
    x = jax.random.normal(key, (B, S, D), dtype=jnp.float32)
    pe = make_positional_encoding(D, MAX_LEN, dtype=x.dtype)
    out = jax.block_until_ready(positional_encoding_forward(x, pe))
    ref = x + pe[:, :S, :]
    assert out.shape == (B, S, D)
    assert jnp.allclose(out, ref, atol=1e-6), "mismatch (lane-dense, batch-blocked)"

    # 2) Non-lane-dense fallback path (S*D not a multiple of 128).
    B2, S2, D2 = 2, 5, 24
    x2 = jax.random.normal(jax.random.PRNGKey(0), (B2, S2, D2), dtype=jnp.float32)
    pe2 = make_positional_encoding(D2, MAX_LEN, dtype=x2.dtype)
    out2 = jax.block_until_ready(positional_encoding_forward(x2, pe2))
    ref2 = x2 + pe2[:, :S2, :]
    assert jnp.allclose(out2, ref2, atol=1e-6), "mismatch (fallback path)"

    # 3) Exercise the row-tiled path (partial last row tile) cheaply by
    #    shrinking the target block size for this check only.
    B3, S3, D3 = 2, 160, 128
    x3 = jax.random.normal(jax.random.PRNGKey(0), (B3, S3, D3), dtype=jnp.float32)
    pe3 = make_positional_encoding(D3, MAX_LEN, dtype=x3.dtype)
    out3 = jax.block_until_ready(
        positional_encoding_forward(x3, pe3, target_block_bytes=64 * 1024))
    ref3 = x3 + pe3[:, :S3, :]
    assert jnp.allclose(out3, ref3, atol=1e-6), "mismatch (row-tiled path)"

    # 4) bf16 path (dtype-aware sublane rounding).
    x4 = x3.astype(jnp.bfloat16)
    pe4 = make_positional_encoding(D3, MAX_LEN, dtype=jnp.bfloat16)
    out4 = jax.block_until_ready(
        positional_encoding_forward(x4, pe4, target_block_bytes=64 * 1024))
    ref4 = x4 + pe4[:, :S3, :]
    assert jnp.allclose(out4.astype(jnp.float32), ref4.astype(jnp.float32),
                        atol=1e-2), "mismatch (bf16 path)"

    print("KERNEL_OK")
</pallas_src>

<mosaic_0001>
module attributes {stable_mosaic.version = 11 : i64} {
  func.func @_pe_add_kernel(%arg0: i32, %arg1: i32, %arg2: memref<2x2x128xf32, #tpu.memory_space<vmem>>, %arg3: memref<2x128xf32, #tpu.memory_space<vmem>>, %arg4: memref<2x2x128xf32, #tpu.memory_space<vmem>>) attributes {dimension_semantics = [#tpu.dimension_semantics<arbitrary>, #tpu.dimension_semantics<parallel>], iteration_bounds = array<i64: 1, 1>, scalar_prefetch = 0 : i64, scratch_operands = 0 : i64, tpu.core_type = #tpu.core_type<tc>, window_params = [{transform_indices = @transform_0, window_bounds = array<i64: 2, 2, 128>}, {transform_indices = @transform_1, window_bounds = array<i64: 2, 128>}, {transform_indices = @transform_2, window_bounds = array<i64: 2, 2, 128>}]} {
    %c0 = arith.constant 0 : index
    %c0_0 = arith.constant 0 : index
    %c0_1 = arith.constant 0 : index
    %0 = vector.load %arg2[%c0, %c0_0, %c0_1] : memref<2x2x128xf32, #tpu.memory_space<vmem>>, vector<2x2x128xf32>
    %c0_2 = arith.constant 0 : index
    %c0_3 = arith.constant 0 : index
    %1 = vector.load %arg3[%c0_2, %c0_3] : memref<2x128xf32, #tpu.memory_space<vmem>>, vector<2x128xf32>
    %2 = vector.shape_cast %1 : vector<2x128xf32> to vector<1x2x128xf32>
    %3 = vector.broadcast %2 : vector<1x2x128xf32> to vector<2x2x128xf32>
    %4 = arith.addf %0, %3 : vector<2x2x128xf32>
    %c0_4 = arith.constant 0 : index
    %c0_5 = arith.constant 0 : index
    %c0_6 = arith.constant 0 : index
    %5 = vector.load %arg4[%c0_4, %c0_5, %c0_6] : memref<2x2x128xf32, #tpu.memory_space<vmem>>, vector<2x2x128xf32>
    tpu.vector_store %arg4[%c0_4, %c0_5, %c0_6], %4 {strides = array<i32>} : memref<2x2x128xf32, #tpu.memory_space<vmem>>, vector<2x2x128xf32>,
    return
  }
  func.func @transform_0(%arg0: i32, %arg1: i32) -> (i32, i32, i32) {
    %c0_i32 = arith.constant 0 : i32
    %c0_i32_0 = arith.constant 0 : i32
    return %arg1, %arg0, %c0_i32 : i32, i32, i32
  }
  func.func @transform_1(%arg0: i32, %arg1: i32) -> (i32, i32) {
    %c0_i32 = arith.constant 0 : i32
    %c0_i32_0 = arith.constant 0 : i32
    return %arg0, %c0_i32 : i32, i32
  }
  func.func @transform_2(%arg0: i32, %arg1: i32) -> (i32, i32, i32) {
    %c0_i32 = arith.constant 0 : i32
    %c0_i32_0 = arith.constant 0 : i32
    return %arg1, %arg0, %c0_i32 : i32, i32, i32
  }
}

</mosaic_0001>

<bundles_post_ra>
// kernel: tpu_custom_call.1
= control target key start
LH: loop header
LB: loop body
LE: loop exit
PB: predicated region body
PF: predicated region fallthrough
CT: control target
= control target key end

     0   :  { %7 = vsyncpa [#allocation3], 0  ;;  %s181_s0 = inlined_call_operand.hbm [shape: f32[2,2,128], index: 0, kind: input, shape index: {}]   ;;  %s182_s1 = inlined_call_operand.hbm [shape: f32[2,128], index: 1, kind: input, shape index: {}]   ;;  %s183_s2 = inlined_call_operand.hbm [shape: f32[2,2,128], index: 2, kind: output, shape index: {}]  }
   0x1   :  { %8 = vsyncpa [#allocation6], 0 }
   0x2   :  { %9 = vsyncpa [#allocation4], 0  ;;  %s14_s11 = sshll.u32 %s181_s0, 4  ;;  %s152_s12 = smov [#allocation2]   ;;  %s15_s11 = int_to_ptr.hbm [resolvable:$true] %s14_s11 }
   0x3   :  { %s16_s13 = sshll.u32 %s152_s12, 4  ;;  %s28_s16 = sshll.u32 %s182_s1, 4  ;;  %s17_s13 = int_to_ptr.vmem [resolvable:$true] %s16_s13  ;;  %s29_s16 = int_to_ptr.hbm [resolvable:$true] %s28_s16 }
   0x4   :  { %s153_s17 = smov 32   ;;  %s154_s18 = smov 2  }
   0x5   :  { %22 = dma.hbm_to_vmem [thread:$0]  %s15_s11, 64, %s17_s13, [#allocation3], %s153_s17, %s153_s17, %s154_s18  }
   0x6   :  { %s155_s19 = smov [#allocation5]  }
   0x7   :  { %s30_s20 = sshll.u32 %s155_s19, 4  ;;  %s31_s20 = int_to_ptr.vmem [resolvable:$true] %s30_s20 }
   0x8   :  { %33 = dma.hbm_to_vmem [thread:$0]  %s29_s16, 32, %s31_s20, [#allocation6]  }
   0x9   :  { %146 = dma.done.wait [#allocation3], 64  }
   0xa   :  { %147 = vsyncadd [#allocation3], 4294967232 }
   0xb   :  { %148 = dma.done.wait [#allocation6], 32  }
   0xc   :  { %149 = vsyncadd [#allocation6], 4294967264  ;;  %s156_s0 = smov [#allocation7]   ;;  %s55_s24 = sshll.u32 %s183_s2, 4  ;;  %v42_v0 = vld [vmem:[#allocation2] sm:$0x3]  ;;  %s56_s24 = int_to_ptr.hbm [resolvable:$true] %s55_s24 }
   0xd   :  { %s53_s21 = sshll.u32 %s156_s0, 4  ;;  %v44_v1 = vld [vmem:[#allocation5] sm:$0x3]  ;;  %v43_v2 = vld [vmem:[#allocation2 + $0x2] sm:$0x3]  ;;  %s54_s21 = int_to_ptr.vmem [resolvable:$true] %s53_s21 }
   0xe   :  { %v45_v3 = vadd.f32 %v44_v1, %v42_v0  ;;  %v46_v4 = vadd.f32 %v44_v1, %v43_v2 }
  0x10   :  { %47 = vst [vmem:[#allocation7] sm:$0x3] %v45_v3 }
  0x11   :  { %48 = vst [vmem:[#allocation7 + $0x2] sm:$0x3] %v46_v4 }
  0x12   :  { %61 = dma.vmem_to_hbm [thread:$0]  %s54_s21, 64, %s56_s24, [#allocation4], %s153_s17, %s153_s17, %s154_s18  }
  0x13   :  { %150 = dma.done.wait [#allocation4], 64  }
  0x14   :  { %151 = vsyncadd [#allocation4], 4294967232 }
  0x15   :  { %66 = vsyncpa [#allocation3], 1 }
  0x16   :  { %67 = vsyncpa [#allocation6], 1 }
  0x17   :  { %68 = vsyncpa [#allocation4], 1 }

</bundles_post_ra>
